<compile_context>
chip_gen: v6e
topology: v6e:2x2x1
jax: 0.10.0
libtpu: 0.0.40
codegen_flags: <defaults>
</compile_context>

<pallas_src>
import jax
import jax.numpy as jnp
from jax.experimental import pallas as pl
from jax.experimental.pallas import tpu as pltpu


def _round_up(x, m):
    return ((x + m - 1) // m) * m


def _pad2(a, shape):
    """Zero-pad a 2-D array up to `shape`."""
    return jnp.pad(a, [(0, s - d) for d, s in zip(a.shape, shape)])


def _simclr_fused_kernel(x_ref, we_ref, be_ref, w1_ref, b1_ref, w2_ref, b2_ref,
                         o_ref, acc_ref):
    """One grid step = (branch i, encoder-reduction tile k).

    The encoder matmul is accumulated over k into a VMEM f32 scratch; the
    projection head and L2 normalize run once per branch on the last k step.
    """
    k = pl.program_id(1)

    @pl.when(k == 0)
    def _():
        acc_ref[...] = jnp.zeros_like(acc_ref)

    # Encoder partial product for this F tile.
    acc_ref[...] += jnp.dot(x_ref[0], we_ref[0],
                            preferred_element_type=jnp.float32)

    @pl.when(k == pl.num_programs(1) - 1)
    def _():
        # Encoder bias + ReLU.
        h = jnp.maximum(acc_ref[...] + be_ref[0], 0.0)
        # Projection head layer 1: linear + ReLU.
        z = jnp.dot(h, w1_ref[0], preferred_element_type=jnp.float32) + b1_ref[0]
        z = jnp.maximum(z, 0.0)
        # Projection head layer 2: linear (no activation).
        z = jnp.dot(z, w2_ref[0], preferred_element_type=jnp.float32) + b2_ref[0]
        # F.normalize(z, dim=1): z / max(||z||, 1e-12) == z * rsqrt(max(||z||^2, 1e-24)).
        sq = jnp.sum(z * z, axis=1, keepdims=True)
        inv = jax.lax.rsqrt(jnp.maximum(sq, 1e-24))
        o_ref[0] = (z * inv).astype(o_ref.dtype)


def simclr_forward(x1_nchw, x2_nchw, params1, params2):
    """Full Simclr.forward: returns (X1, X2), each [B, p_dim], rows L2-normalized."""
    B = x1_nchw.shape[0]
    x1 = x1_nchw.reshape(B, -1).astype(jnp.float32)
    x2 = x2_nchw.reshape(B, -1).astype(jnp.float32)

    we1, be1, w11, b11, w21, b21 = params1
    we2, be2, w12, b12, w22, b22 = params2

    F1, F2 = x1.shape[1], x2.shape[1]
    size1, size2 = we1.shape[1], we2.shape[1]
    p_dim = w21.shape[1]

    # Sublane/lane-friendly padded dims (zero padding is exact: padded weight
    # columns/rows and bias entries are zero, so padded outputs are zero and do
    # not perturb the L2 norm; padded batch rows are sliced off at the end).
    Bp = _round_up(max(B, 8), 8)              # >= 8 sublanes, no masked stores
    Fp = _round_up(max(F1, F2), 128)          # shared encoder-input width
    Sp = _round_up(max(size1, size2), 128)    # lane-dense latent width
    Pp = _round_up(p_dim, 128)                # lane-dense projection width

    # Reduction tile on the F axis: largest multiple of 128 (<= 512) dividing Fp.
    tk = Fp
    for cand in (512, 384, 256, 128):
        if cand <= Fp and Fp % cand == 0:
            tk = cand
            break
    kt = Fp // tk

    f32 = jnp.float32
    # Stack the two branches along a leading axis of size 2.
    X = jnp.stack([_pad2(x1, (Bp, Fp)), _pad2(x2, (Bp, Fp))]).astype(f32)
    WE = jnp.stack([_pad2(we1, (Fp, Sp)), _pad2(we2, (Fp, Sp))]).astype(f32)
    BE = jnp.stack([
        jnp.broadcast_to(_pad2(be1, (1, Sp)), (Bp, Sp)),
        jnp.broadcast_to(_pad2(be2, (1, Sp)), (Bp, Sp)),
    ]).astype(f32)
    W1 = jnp.stack([_pad2(w11, (Sp, Pp)), _pad2(w12, (Sp, Pp))]).astype(f32)
    B1 = jnp.stack([
        jnp.broadcast_to(_pad2(b11, (1, Pp)), (Bp, Pp)),
        jnp.broadcast_to(_pad2(b12, (1, Pp)), (Bp, Pp)),
    ]).astype(f32)
    W2 = jnp.stack([_pad2(w21, (Pp, Pp)), _pad2(w22, (Pp, Pp))]).astype(f32)
    B2 = jnp.stack([
        jnp.broadcast_to(_pad2(b21, (1, Pp)), (Bp, Pp)),
        jnp.broadcast_to(_pad2(b22, (1, Pp)), (Bp, Pp)),
    ]).astype(f32)

    flops = 2 * (2 * Bp * Fp * Sp + 2 * Bp * Sp * Pp + 2 * Bp * Pp * Pp)
    bytes_accessed = sum(int(a.size) * 4 for a in (X, WE, BE, W1, B1, W2, B2)) \
        + 2 * Bp * Pp * 4

    out = pl.pallas_call(
        _simclr_fused_kernel,
        out_shape=jax.ShapeDtypeStruct((2, Bp, Pp), jnp.float32),
        grid_spec=pltpu.PrefetchScalarGridSpec(
            num_scalar_prefetch=0,
            grid=(2, kt),
            in_specs=[
                pl.BlockSpec((1, Bp, tk), lambda i, k: (i, 0, k)),   # X tile
                pl.BlockSpec((1, tk, Sp), lambda i, k: (i, k, 0)),   # W_enc tile
                pl.BlockSpec((1, Bp, Sp), lambda i, k: (i, 0, 0)),   # b_enc
                pl.BlockSpec((1, Sp, Pp), lambda i, k: (i, 0, 0)),   # W1
                pl.BlockSpec((1, Bp, Pp), lambda i, k: (i, 0, 0)),   # b1
                pl.BlockSpec((1, Pp, Pp), lambda i, k: (i, 0, 0)),   # W2
                pl.BlockSpec((1, Bp, Pp), lambda i, k: (i, 0, 0)),   # b2
            ],
            out_specs=pl.BlockSpec((1, Bp, Pp), lambda i, k: (i, 0, 0)),
            scratch_shapes=[pltpu.VMEM((Bp, Sp), jnp.float32)],
        ),
        compiler_params=pltpu.CompilerParams(
            dimension_semantics=("parallel", "arbitrary")),
        cost_estimate=pl.CostEstimate(
            flops=flops, transcendentals=2 * Bp, bytes_accessed=bytes_accessed),
    )(X, WE, BE, W1, B1, W2, B2)

    z1 = out[0, :B, :p_dim]
    z2 = out[1, :B, :p_dim]
    return z1, z2


def _make_branch_params(key, in_features, size, p_dim):
    k = jax.random.split(key, 6)
    scale = lambda fan_in: 1.0 / jnp.sqrt(jnp.float32(fan_in))
    w_enc = jax.random.normal(k[0], (in_features, size), jnp.float32) * scale(in_features)
    b_enc = jax.random.normal(k[1], (1, size), jnp.float32) * 0.01
    w1 = jax.random.normal(k[2], (size, p_dim), jnp.float32) * scale(size)
    b1 = jax.random.normal(k[3], (1, p_dim), jnp.float32) * 0.01
    w2 = jax.random.normal(k[4], (p_dim, p_dim), jnp.float32) * scale(p_dim)
    b2 = jax.random.normal(k[5], (1, p_dim), jnp.float32) * 0.01
    return (w_enc, b_enc, w1, b1, w2, b2)


def _reference_branch(x_flat, w_enc, b_enc, w1, b1, w2, b2):
    h = jnp.maximum(x_flat @ w_enc + b_enc, 0.0)
    z = jnp.maximum(h @ w1 + b1, 0.0)
    z = z @ w2 + b2
    n = jnp.maximum(jnp.sqrt(jnp.sum(z * z, axis=1, keepdims=True)), 1e-12)
    return z / n


if __name__ == "__main__":
    key = jax.random.PRNGKey(0)
    k_x1, k_x2, k_p1, k_p2 = jax.random.split(key, 4)

    # Small image-like inputs for the two views (NCHW).
    B = 2
    x1 = jax.random.normal(k_x1, (B, 4, 16, 16), jnp.float32)  # view 1
    x2 = jax.random.normal(k_x2, (B, 4, 8, 8), jnp.float32)    # view 2

    size, size2 = 64, 32          # latent sizes of the two encoders
    p_dim = 128                   # projection_dim (default), p_depth = 2

    params1 = _make_branch_params(k_p1, 4 * 16 * 16, size, p_dim)
    params2 = _make_branch_params(k_p2, 4 * 8 * 8, size2, p_dim)

    z1, z2 = simclr_forward(x1, x2, params1, params2)
    jax.block_until_ready((z1, z2))

    # Sanity check vs. pure-JAX reference.
    r1 = _reference_branch(x1.reshape(B, -1), *params1)
    r2 = _reference_branch(x2.reshape(B, -1), *params2)
    assert z1.shape == (B, p_dim) and z2.shape == (B, p_dim)
    assert jnp.max(jnp.abs(z1 - r1)) < 5e-4
    assert jnp.max(jnp.abs(z2 - r2)) < 5e-4
    # Rows are unit-norm.
    assert jnp.max(jnp.abs(jnp.linalg.norm(z1, axis=1) - 1.0)) < 1e-4
    assert jnp.max(jnp.abs(jnp.linalg.norm(z2, axis=1) - 1.0)) < 1e-4

    print("KERNEL_OK")
</pallas_src>

<mosaic_0001>
module attributes {stable_mosaic.version = 11 : i64} {
  func.func @_simclr_fused_kernel(%arg0: i32, %arg1: i32, %arg2: memref<1x8x512xf32, #tpu.memory_space<vmem>>, %arg3: memref<1x512x128xf32, #tpu.memory_space<vmem>>, %arg4: memref<1x8x128xf32, #tpu.memory_space<vmem>>, %arg5: memref<1x128x128xf32, #tpu.memory_space<vmem>>, %arg6: memref<1x8x128xf32, #tpu.memory_space<vmem>>, %arg7: memref<1x128x128xf32, #tpu.memory_space<vmem>>, %arg8: memref<1x8x128xf32, #tpu.memory_space<vmem>>, %arg9: memref<1x8x128xf32, #tpu.memory_space<vmem>>, %arg10: memref<8x128xf32, #tpu.memory_space<vmem>>) attributes {dimension_semantics = [#tpu.dimension_semantics<parallel>, #tpu.dimension_semantics<arbitrary>], iteration_bounds = array<i64: 2, 2>, scalar_prefetch = 0 : i64, scratch_operands = 1 : i64, tpu.core_type = #tpu.core_type<tc>, window_params = [{transform_indices = @transform_0, window_bounds = array<i64: 1, 8, 512>}, {transform_indices = @transform_1, window_bounds = array<i64: 1, 512, 128>}, {transform_indices = @transform_2, window_bounds = array<i64: 1, 8, 128>}, {transform_indices = @transform_3, window_bounds = array<i64: 1, 128, 128>}, {transform_indices = @transform_4, window_bounds = array<i64: 1, 8, 128>}, {transform_indices = @transform_5, window_bounds = array<i64: 1, 128, 128>}, {transform_indices = @transform_6, window_bounds = array<i64: 1, 8, 128>}, {transform_indices = @transform_7, window_bounds = array<i64: 1, 8, 128>}]} {
    %c0_i32 = arith.constant 0 : i32
    %0 = arith.cmpi eq, %arg1, %c0_i32 : i32
    %1 = arith.extui %0 : i1 to i32
    %c0_i32_0 = arith.constant 0 : i32
    %2 = arith.cmpi ne, %1, %c0_i32_0 : i32
    scf.if %2 {
      %cst_11 = arith.constant 0.000000e+00 : f32
      %14 = vector.broadcast %cst_11 : f32 to vector<8x128xf32>
      %c0_12 = arith.constant 0 : index
      %c0_13 = arith.constant 0 : index
      %15 = vector.load %arg10[%c0_12, %c0_13] : memref<8x128xf32, #tpu.memory_space<vmem>>, vector<8x128xf32>
      tpu.vector_store %arg10[%c0_12, %c0_13], %14 {strides = array<i32>} : memref<8x128xf32, #tpu.memory_space<vmem>>, vector<8x128xf32>,
    } else {
    }
    %c0 = arith.constant 0 : index
    %c0_1 = arith.constant 0 : index
    %3 = vector.load %arg10[%c0, %c0_1] : memref<8x128xf32, #tpu.memory_space<vmem>>, vector<8x128xf32>
    %c0_2 = arith.constant 0 : index
    %c0_3 = arith.constant 0 : index
    %c0_4 = arith.constant 0 : index
    %4 = vector.load %arg2[%c0_2, %c0_3, %c0_4] : memref<1x8x512xf32, #tpu.memory_space<vmem>>, vector<1x8x512xf32>
    %5 = vector.shape_cast %4 : vector<1x8x512xf32> to vector<8x512xf32>
    %c0_5 = arith.constant 0 : index
    %c0_6 = arith.constant 0 : index
    %c0_7 = arith.constant 0 : index
    %6 = vector.load %arg3[%c0_5, %c0_6, %c0_7] : memref<1x512x128xf32, #tpu.memory_space<vmem>>, vector<1x512x128xf32>
    %7 = vector.shape_cast %6 : vector<1x512x128xf32> to vector<512x128xf32>
    %cst = arith.constant dense<0.000000e+00> : vector<8x128xf32>
    %8 = tpu.matmul %5, %7, %cst {dimension_numbers = #tpu.dot_dimension_numbers<[1], [0], [0], [1], [0, 0, 1, 1], [], []>} : vector<8x512xf32>, vector<512x128xf32>, vector<8x128xf32> -> vector<8x128xf32>
    %9 = arith.addf %3, %8 : vector<8x128xf32>
    %c0_8 = arith.constant 0 : index
    %c0_9 = arith.constant 0 : index
    %10 = vector.load %arg10[%c0_8, %c0_9] : memref<8x128xf32, #tpu.memory_space<vmem>>, vector<8x128xf32>
    tpu.vector_store %arg10[%c0_8, %c0_9], %9 {strides = array<i32>} : memref<8x128xf32, #tpu.memory_space<vmem>>, vector<8x128xf32>,
    %c1_i32 = arith.constant 1 : i32
    %11 = arith.cmpi eq, %arg1, %c1_i32 : i32
    %12 = arith.extui %11 : i1 to i32
    %c0_i32_10 = arith.constant 0 : i32
    %13 = arith.cmpi ne, %12, %c0_i32_10 : i32
    scf.if %13 {
      %c0_11 = arith.constant 0 : index
      %c0_12 = arith.constant 0 : index
      %14 = vector.load %arg10[%c0_11, %c0_12] : memref<8x128xf32, #tpu.memory_space<vmem>>, vector<8x128xf32>
      %c0_13 = arith.constant 0 : index
      %c0_14 = arith.constant 0 : index
      %c0_15 = arith.constant 0 : index
      %15 = vector.load %arg4[%c0_13, %c0_14, %c0_15] : memref<1x8x128xf32, #tpu.memory_space<vmem>>, vector<1x8x128xf32>
      %16 = vector.shape_cast %15 : vector<1x8x128xf32> to vector<8x128xf32>
      %17 = arith.addf %14, %16 : vector<8x128xf32>
      %cst_16 = arith.constant 0.000000e+00 : f32
      %18 = vector.broadcast %cst_16 : f32 to vector<8x128xf32>
      %19 = arith.maximumf %17, %18 : vector<8x128xf32>
      %c0_17 = arith.constant 0 : index
      %c0_18 = arith.constant 0 : index
      %c0_19 = arith.constant 0 : index
      %20 = vector.load %arg5[%c0_17, %c0_18, %c0_19] : memref<1x128x128xf32, #tpu.memory_space<vmem>>, vector<1x128x128xf32>
      %21 = vector.shape_cast %20 : vector<1x128x128xf32> to vector<128x128xf32>
      %cst_20 = arith.constant dense<0.000000e+00> : vector<8x128xf32>
      %22 = tpu.matmul %19, %21, %cst_20 {dimension_numbers = #tpu.dot_dimension_numbers<[1], [0], [0], [1], [0, 0, 1, 1], [], []>} : vector<8x128xf32>, vector<128x128xf32>, vector<8x128xf32> -> vector<8x128xf32>
      %c0_21 = arith.constant 0 : index
      %c0_22 = arith.constant 0 : index
      %c0_23 = arith.constant 0 : index
      %23 = vector.load %arg6[%c0_21, %c0_22, %c0_23] : memref<1x8x128xf32, #tpu.memory_space<vmem>>, vector<1x8x128xf32>
      %24 = vector.shape_cast %23 : vector<1x8x128xf32> to vector<8x128xf32>
      %25 = arith.addf %22, %24 : vector<8x128xf32>
      %cst_24 = arith.constant 0.000000e+00 : f32
      %26 = vector.broadcast %cst_24 : f32 to vector<8x128xf32>
      %27 = arith.maximumf %25, %26 : vector<8x128xf32>
      %c0_25 = arith.constant 0 : index
      %c0_26 = arith.constant 0 : index
      %c0_27 = arith.constant 0 : index
      %28 = vector.load %arg7[%c0_25, %c0_26, %c0_27] : memref<1x128x128xf32, #tpu.memory_space<vmem>>, vector<1x128x128xf32>
      %29 = vector.shape_cast %28 : vector<1x128x128xf32> to vector<128x128xf32>
      %cst_28 = arith.constant dense<0.000000e+00> : vector<8x128xf32>
      %30 = tpu.matmul %27, %29, %cst_28 {dimension_numbers = #tpu.dot_dimension_numbers<[1], [0], [0], [1], [0, 0, 1, 1], [], []>} : vector<8x128xf32>, vector<128x128xf32>, vector<8x128xf32> -> vector<8x128xf32>
      %c0_29 = arith.constant 0 : index
      %c0_30 = arith.constant 0 : index
      %c0_31 = arith.constant 0 : index
      %31 = vector.load %arg8[%c0_29, %c0_30, %c0_31] : memref<1x8x128xf32, #tpu.memory_space<vmem>>, vector<1x8x128xf32>
      %32 = vector.shape_cast %31 : vector<1x8x128xf32> to vector<8x128xf32>
      %33 = arith.addf %30, %32 : vector<8x128xf32>
      %34 = arith.mulf %33, %33 : vector<8x128xf32>
      %cst_32 = arith.constant dense<0.000000e+00> : vector<8xf32>
      %35 = vector.multi_reduction <add>, %34, %cst_32 [1] : vector<8x128xf32> to vector<8xf32>
      %36 = vector.shape_cast %35 : vector<8xf32> to vector<8x1xf32>
      %cst_33 = arith.constant 1.000000e-24 : f32
      %37 = vector.broadcast %cst_33 : f32 to vector<8x1xf32>
      %38 = arith.maximumf %36, %37 : vector<8x1xf32>
      %39 = math.rsqrt %38 : vector<8x1xf32>
      %40 = vector.broadcast %39 : vector<8x1xf32> to vector<8x128xf32>
      %41 = arith.mulf %33, %40 : vector<8x128xf32>
      %c0_34 = arith.constant 0 : index
      %c0_35 = arith.constant 0 : index
      %c0_36 = arith.constant 0 : index
      %42 = vector.load %arg9[%c0_34, %c0_35, %c0_36] : memref<1x8x128xf32, #tpu.memory_space<vmem>>, vector<1x8x128xf32>
      %43 = vector.shape_cast %42 : vector<1x8x128xf32> to vector<8x128xf32>
      %44 = vector.shape_cast %41 : vector<8x128xf32> to vector<1x8x128xf32>
      tpu.vector_store %arg9[%c0_34, %c0_35, %c0_36], %44 {strides = array<i32>} : memref<1x8x128xf32, #tpu.memory_space<vmem>>, vector<1x8x128xf32>,
    } else {
    }
    return
  }
  func.func @transform_0(%arg0: i32, %arg1: i32) -> (i32, i32, i32) {
    %c0_i32 = arith.constant 0 : i32
    %c0_i32_0 = arith.constant 0 : i32
    return %arg0, %c0_i32, %arg1 : i32, i32, i32
  }
  func.func @transform_1(%arg0: i32, %arg1: i32) -> (i32, i32, i32) {
    %c0_i32 = arith.constant 0 : i32
    %c0_i32_0 = arith.constant 0 : i32
    return %arg0, %arg1, %c0_i32 : i32, i32, i32
  }
  func.func @transform_2(%arg0: i32, %arg1: i32) -> (i32, i32, i32) {
    %c0_i32 = arith.constant 0 : i32
    %c0_i32_0 = arith.constant 0 : i32
    %c0_i32_1 = arith.constant 0 : i32
    return %arg0, %c0_i32, %c0_i32_0 : i32, i32, i32
  }
  func.func @transform_3(%arg0: i32, %arg1: i32) -> (i32, i32, i32) {
    %c0_i32 = arith.constant 0 : i32
    %c0_i32_0 = arith.constant 0 : i32
    %c0_i32_1 = arith.constant 0 : i32
    return %arg0, %c0_i32, %c0_i32_0 : i32, i32, i32
  }
  func.func @transform_4(%arg0: i32, %arg1: i32) -> (i32, i32, i32) {
    %c0_i32 = arith.constant 0 : i32
    %c0_i32_0 = arith.constant 0 : i32
    %c0_i32_1 = arith.constant 0 : i32
    return %arg0, %c0_i32, %c0_i32_0 : i32, i32, i32
  }
  func.func @transform_5(%arg0: i32, %arg1: i32) -> (i32, i32, i32) {
    %c0_i32 = arith.constant 0 : i32
    %c0_i32_0 = arith.constant 0 : i32
    %c0_i32_1 = arith.constant 0 : i32
    return %arg0, %c0_i32, %c0_i32_0 : i32, i32, i32
  }
  func.func @transform_6(%arg0: i32, %arg1: i32) -> (i32, i32, i32) {
    %c0_i32 = arith.constant 0 : i32
    %c0_i32_0 = arith.constant 0 : i32
    %c0_i32_1 = arith.constant 0 : i32
    return %arg0, %c0_i32, %c0_i32_0 : i32, i32, i32
  }
  func.func @transform_7(%arg0: i32, %arg1: i32) -> (i32, i32, i32) {
    %c0_i32 = arith.constant 0 : i32
    %c0_i32_0 = arith.constant 0 : i32
    %c0_i32_1 = arith.constant 0 : i32
    return %arg0, %c0_i32, %c0_i32_0 : i32, i32, i32
  }
}

</mosaic_0001>

<bundles_post_ra>
// kernel: tpu_custom_call.1
= control target key start
LH: loop header
LB: loop body
LE: loop exit
PB: predicated region body
PF: predicated region fallthrough
CT: control target
= control target key end

     0   :  { %s2419_s0 = inlined_call_operand.hbm [shape: f32[2,8,1024], index: 0, kind: input, shape index: {}]   ;;  %s2420_s1 = inlined_call_operand.hbm [shape: f32[2,1024,128], index: 1, kind: input, shape index: {}]   ;;  %s2421_s2 = inlined_call_operand.hbm [shape: f32[2,8,128], index: 2, kind: input, shape index: {}]   ;;  %s2422_s3 = inlined_call_operand.hbm [shape: f32[2,128,128], index: 3, kind: input, shape index: {}]   ;;  %s2423_s4 = inlined_call_operand.hbm [shape: f32[2,8,128], index: 4, kind: input, shape index: {}]   ;;  %s2424_s5 = inlined_call_operand.hbm [shape: f32[2,128,128], index: 5, kind: input, shape index: {}]   ;;  %s2425_s6 = inlined_call_operand.hbm [shape: f32[2,8,128], index: 6, kind: input, shape index: {}]   ;;  %s2426_s7 = inlined_call_operand.hbm [shape: f32[2,8,128], index: 7, kind: output, shape index: {}]  }
   0x1   :  { %2456 = sst [smem:[#allocation39_spill]] %s2420_s1 }
   0x2   :  { %2457 = sst [smem:[#allocation40_spill]] %s2422_s3 }
   0x3   :  { %2458 = sst [smem:[#allocation41_spill]] %s2424_s5 }
   0x4   :  { %2459 = sst [smem:[#allocation42_spill]] %s2425_s6 }
   0x5   :  { %2460 = sst [smem:[#allocation43_spill]] %s2426_s7 }
   0x6   :  { %12 = vsyncpa [#allocation4], 0 }
   0x7   :  { %14 = vsyncpa [#allocation4 + $0x1], 0 }
   0x8   :  { %15 = vsyncpa [#allocation7], 0 }
   0x9   :  { %17 = vsyncpa [#allocation7 + $0x1], 0 }
   0xa   :  { %18 = vsyncpa [#allocation10], 0 }
   0xb   :  { %20 = vsyncpa [#allocation10 + $0x1], 0 }
   0xc   :  { %21 = vsyncpa [#allocation13], 0 }
   0xd   :  { %23 = vsyncpa [#allocation13 + $0x1], 0 }
   0xe   :  { %24 = vsyncpa [#allocation5], 0 }
   0xf   :  { %26 = vsyncpa [#allocation5 + $0x1], 0  ;;  %s1916_s24 = smov 0   ;;  %s1918_s25 = smov 0  }
  0x10   :  { %s1920_s26 = smov 0   ;;  %s1922_s27 = smov 0  }
  0x11   :  { %s1924_s28 = smov 0   ;;  %s1926_s29 = smov 0  }
  0x12   :  { %s1928_s30 = smov 0   ;;  %s1930_s8 = smov 0  }
  0x13   :  { %s1932_s9 = smov 0   ;;  %s1934_s10 = smov 0  }
  0x14   :  { %s1936_s11 = smov 0  }
  0x15 LB: > { %2461 = sst [smem:[#allocation22_spill]] %s1821_s24  ;;  %s1970_s12 = sadd.s32 4294967295, %s1861_s11   ;;  %s1861_s11 = sphi %s1936_s11, %s32_s11   ;;  %s1857_s10 = sphi %s1934_s10, %s2526_s10   ;;  %s1853_s9 = sphi %s1932_s9, %s2525_s9   ;;  %s1849_s8 = sphi %s1930_s8, %s2524_s8   ;;  %s1845_s30 = sphi %s1928_s30, %s2523_s30   ;;  %s1841_s29 = sphi %s1926_s29, %s2518_s29   ;;  %s1837_s28 = sphi %s1924_s28, %s2517_s28   ;;  %s1833_s27 = sphi %s1922_s27, %s2516_s27   ;;  %s1829_s26 = sphi %s1920_s26, %s2522_s26   ;;  %s1825_s25 = sphi %s1918_s25, %s2521_s25   ;;  %s1821_s24 = sphi %s1916_s24, %s2514_s24  }
  0x16   : > { %2462 = sst [smem:[#allocation23_spill]] %s1825_s25  ;;  %s41_s13 = sadd.s32 1, %s1853_s9 }
  0x17   : > { %2463 = sst [smem:[#allocation24_spill]] %s1837_s28  ;;  %p42_p0 = scmp.ge.s32.totalorder %s41_s13, 2 }
  0x18   : > { %2464 = sst [smem:[#allocation25_spill]] %s1841_s29  ;;  %s44_s14 = sadd.s32 1, %s1857_s10 }
  0x19   : > { %2465 = sst [smem:[#allocation26_spill]] %s1845_s30  ;;  %s53_s15 = sadd.s32 1, %s1841_s29 }
  0x1a   : > { %2466 = sst [smem:[#allocation27_spill]] %s1849_s8  ;;  %p60_p1 = scmp.ne.s32.totalorder %s1841_s29, %s1837_s28 }
  0x1b   : > { %2467 = sst [smem:[#allocation28_spill]] %s1861_s11  ;;  %s2528_s13 = smov (%p42_p0, %s41_s13), 0 }
  0x1c   : > { %2468 = sst [smem:[#allocation29_spill]] %s1970_s12  ;;  %s2530_s14 = smov (!%p42_p0, %s44_s14), %s1857_s10 }
  0x1d   : > { %2469 = sst [smem:[#allocation30_spill]] %s2528_s13  ;;  %s49_s16 = ssub.s32 %s1853_s9, %s2528_s13 }
  0x1e   : > { %p61_p2 = scmp.eq.s32.totalorder %s1861_s11, 0  ;;  %p46_p3 = scmp.ge.s32.totalorder %s2530_s14, 2 }
  0x1f   : > { %p66_p4 = scmp.ne.s32.totalorder %s1837_s28, %s1833_s27  ;;  %p67_p6 = scmp.eq.s32.totalorder %s1970_s12, 0 }
  0x20   : > { %p62_p5 = por %p61_p2, %p60_p1  ;;  %s2532_s14 = smov (%p46_p3, %s2530_s14), 0 }
  0x21   : > { %2470 = sst [smem:[#allocation31_spill]] %s2532_s14  ;;  %p1991_p7 = por %p67_p6, %p66_p4 }
  0x22   : > { %s1997_s18 = ssub.s32 %s1857_s10, %s2532_s14  ;;  %p2434_p8 = scmp.lt.s32.totalorder %s1861_s11, 4 }
  0x23   : > { %s2471_s17 = scalar_select %p1991_p7, 1, 0 }
  0x24   : > { %s50_s19 = sor.u32 %s49_s16, %s1997_s18  ;;  %p105_p9 = scmp.eq.s32.totalorder %s1997_s18, 0 }
  0x25   : > { %2472 = sst [smem:[#allocation32_spill]] %s2471_s17  ;;  %p51_p10 = scmp.eq.s32.totalorder %s50_s19, 0 }
  0x26   : > { %s2003_s20 = sand.u32 1, %s1841_s29   ;;  %p2007_p11 = pnand %p2434_p8, %p62_p5 }
  0x27   : > { %s2012_s22 = sand.u32 1, %s1861_s11   ;;  %s1183_s27 = sshll.u32 %s2003_s20, 9 }
  0x28   : > { %s2015_s23 = scalar_select %p51_p10, %s1841_s29, %s53_s15  }
  0x29   : > { %s1184_s16 = sshll.u32 %s1853_s9, 6  ;;  %s2020_s14 = sshll.u32 %s1857_s10, 7 }
  0x2a   : > { %2474 = sst [smem:[#allocation33_spill]] %s2015_s23  ;;  %s305_s19 = sadd.s32 %s2020_s14, %s1184_s16 }
  0x2b   : > { %s299_s13 = scalar_lea.vmem [#allocation6], %s1183_s27  ;;  %s1186_s8 = sshll.u32 %s305_s19, 7 }
  0x2c   : > { %s308_s7 = sshll.u32 %s299_s13, 4  ;;  %s2475_s1 = sld [smem:[#allocation39_spill]]  ;;  %s309_s7 = int_to_ptr.vmem [resolvable:$true] %s308_s7 }
  0x2d   : > { %p1199_p12 = scmp.ge.s32.totalorder %s1861_s11, 1  ;;  %s2437_s6 = scalar_lea.sflag [#allocation7], %s2012_s22 }
  0x2e   : > { %p2435_p13 = pneg %p2007_p11  ;;  %s1542_s15 = scalar_lea.vmem %s309_s7, 8192 }
  0x2f   : > { %p1543_p0 = scmp.ne.s32.totalorder %s309_s7, %s1542_s15  ;;  %s1863_s23 = smov [#allocation6]  }
  0x30   : > { %s1547_s16 = sshll.u32 %s1863_s23, 4  ;;  %s1548_s16 = int_to_ptr.vmem [resolvable:$false] %s1547_s16 }
  0x31   : > { %p1545_p1 = pnand %p1543_p0, %p2435_p13  ;;  %s1549_s13 = scalar_lea.vmem %s1548_s16, 16384 }
  0x32   : > { %s307_s28 = scalar_lea.hbm %s2475_s1, %s1186_s8  ;;  %p1550_p4 = scmp.lt.s32.totalorder %s309_s7, %s1548_s16 }
  0x33   : > { %p1546_p3 = pneg %p1545_p1  ;;  %p1551_p5 = scmp.lt.s32.totalorder %s1549_s13, %s1542_s15 }
  0x35   : > { %p1552_p10 = por %p1551_p5, %p1550_p4 }
  0x37   : > { %p1553_p8 = pnand %p1552_p10, %p1546_p3 }
  0x39   : > { %1556 = shalt.err (!%p1553_p8)
}
  0x3a   : > { %s2438_s30 = smov 128   ;;  %s2440_s8 = smov 8  }
  0x3b   : > { %1412 = dma.hbm_to_vmem [thread:$0]  (!%p2007_p11), %s307_s28, 8192, %s309_s7, %s2437_s6, %s2438_s30, %s2438_s30, %s2440_s8  }
  0x3c   : > { %p412_p8 = scmp.lt.s32.totalorder %s1861_s11, 5  ;;  %s1176_s23 = sadd.s32 4294967294, %s1861_s11  }
  0x3d   : > { %s107_s27 = sadd.s32 1, %s1829_s26  ;;  %p114_p1 = scmp.ne.s32.totalorder %s1829_s26, %s1825_s25 }
  0x3e   : > { %p2043_p0 = pnand %p1199_p12, %p412_p8  ;;  %p120_p3 = scmp.ne.s32.totalorder %s1825_s25, %s1821_s24 }
  0x3f   : > { %s2052_s19 = scalar_select %p105_p9, %s1829_s26, %s107_s27  }
  0x40   : > { %s2476_s17 = scalar_select %p2043_p0, 1, 0 }
  0x41   : > { %2478 = sst [smem:[#allocation35_spill]] %s2052_s19  ;;  %p248_p4 = scmp.eq.s32.totalorder %s1970_s12, 3 }
  0x42   : > { %2477 = sst [smem:[#allocation34_spill]] %s2476_s17  ;;  %p254_p5 = scmp.eq.s32.totalorder %s1176_s23, 3 }
  0x43   : > { %p116_p10 = por %p114_p1, %p61_p2  ;;  %p2063_p13 = por %p120_p3, %p67_p6 }
  0x44   : > { %p2067_p12 = por %p248_p4, %p114_p1  ;;  %p2071_p8 = por %p254_p5, %p120_p3 }
  0x45   : > { %s2479_s7 = scalar_select %p2063_p13, 1, 0 }
  0x46   : > { %s2481_s28 = scalar_select %p2067_p12, 1, 0 }
  0x47   : > { %2480 = sst [smem:[#allocation36_spill]] %s2479_s7  ;;  %s2444_s15 = sand.u32 1, %s1829_s26  }
  0x48   : > { %2482 = sst [smem:[#allocation37_spill]] %s2481_s28  ;;  %p2485_p9 = scmp.lt.s32.totalorder %s1861_s11, 4 }
  0x49   : > { %s2483_s18 = scalar_select %p2071_p8, 1, 0 }
  0x4a   : > { %p2078_p7 = pnand %p2485_p9, %p116_p10  ;;  %s1189_s13 = sshll.u32 %s2444_s15, 7 }
  0x4b   : > { %2484 = sst [smem:[#allocation38_spill]] %s2483_s18  ;;  %s1214_s23 = sshll.u32 %s1857_s10, 11 }
  0x4c   : > { %s340_s27 = scalar_lea.vmem [#allocation9], %s1189_s13  ;;  %s2487_s3 = sld [smem:[#allocation40_spill]] }
  0x4d   : > { %s347_s6 = sshll.u32 %s340_s27, 4  ;;  %s2454_s29 = scalar_lea.sflag [#allocation10], %s2012_s22  ;;  %s348_s6 = int_to_ptr.vmem [resolvable:$true] %s347_s6 }
  0x4e   : > { %p2091_p2 = pneg %p2078_p7  ;;  %s1570_s18 = scalar_lea.vmem %s348_s6, 2048 }
  0x4f   : > { %p1571_p6 = scmp.ne.s32.totalorder %s348_s6, %s1570_s18  ;;  %s1866_s15 = smov [#allocation9]  }
  0x50   : > { %s1575_s24 = sshll.u32 %s1866_s15, 4  ;;  %s1576_s24 = int_to_ptr.vmem [resolvable:$false] %s1575_s24 }
  0x51   : > { %p1573_p1 = pnand %p1571_p6, %p2091_p2  ;;  %s1577_s27 = scalar_lea.vmem %s1576_s24, 4096 }
  0x52   : > { %s346_s1 = scalar_lea.hbm %s2487_s3, %s1214_s23  ;;  %p1578_p4 = scmp.lt.s32.totalorder %s348_s6, %s1576_s24 }
  0x53   : > { %p1574_p3 = pneg %p1573_p1  ;;  %p1579_p5 = scmp.lt.s32.totalorder %s1577_s27, %s1570_s18 }
  0x55   : > { %p1580_p10 = por %p1579_p5, %p1578_p4 }
  0x57   : > { %p1581_p9 = pnand %p1580_p10, %p1574_p3 }
  0x59   : > { %1584 = shalt.err (!%p1581_p9)
}
  0x5a   : > { %s2489_s30 = smov 8   ;;  %s2490_s8 = smov 128  }
  0x5b   : > { %1418 = dma.hbm_to_vmem [thread:$0]  (!%p2078_p7), %s346_s1, 2048, %s348_s6, %s2454_s29, %s2490_s8, %s2490_s8, %s2489_s30  }
  0x5c   : > { %s2491_s5 = sld [smem:[#allocation41_spill]]  ;;  %s379_s28 = scalar_lea.vmem [#allocation12], %s1189_s13 }
  0x5d   : > { %s386_s24 = sshll.u32 %s379_s28, 4  ;;  %s376_s18 = scalar_lea.sflag [#allocation13], %s2012_s22  ;;  %s387_s24 = int_to_ptr.vmem [resolvable:$true] %s386_s24 }
  0x5e   : > { %s1598_s27 = scalar_lea.vmem %s387_s24, 2048  ;;  %s1867_s7 = smov [#allocation12]  }
  0x5f   : > { %p1599_p6 = scmp.ne.s32.totalorder %s387_s24, %s1598_s27  ;;  %s1603_s25 = sshll.u32 %s1867_s7, 4  ;;  %s1604_s25 = int_to_ptr.vmem [resolvable:$false] %s1603_s25 }
  0x60   : > { %s1605_s12 = scalar_lea.vmem %s1604_s25, 4096  ;;  %p1606_p4 = scmp.lt.s32.totalorder %s387_s24, %s1604_s25 }
  0x61   : > { %p1601_p1 = pnand %p1599_p6, %p2091_p2  ;;  %p1607_p5 = scmp.lt.s32.totalorder %s1605_s12, %s1598_s27 }
  0x62   : > { %s385_s15 = scalar_lea.hbm %s2491_s5, %s1214_s23 }
  0x63   : > { %p1602_p3 = pneg %p1601_p1  ;;  %p1608_p10 = por %p1607_p5, %p1606_p4 }
  0x65   : > { %p1609_p9 = pnand %p1608_p10, %p1602_p3 }
  0x67   : > { %1612 = shalt.err (!%p1609_p9)
}
  0x68   : > { %1424 = dma.hbm_to_vmem [thread:$0]  (!%p2078_p7), %s385_s15, 2048, %s387_s24, %s376_s18, %s2490_s8, %s2490_s8, %s2489_s30  }
  0x69   : > { %s1179_s1 = sshll.u32 %s2003_s20, 5  ;;  %s1180_s3 = sshll.u32 %s1853_s9, 2 }
  0x6a   : > { %s1181_s6 = sshll.u32 %s1857_s10, 3  ;;  %s278_s11 = scalar_lea.vmem [#allocation3], %s1179_s1 }
  0x6b   : > { %s284_s25 = sadd.s32 %s1181_s6, %s1180_s3  ;;  %s288_s12 = sshll.u32 %s278_s11, 4  ;;  %s289_s12 = int_to_ptr.vmem [resolvable:$true] %s288_s12 }
  0x6c   : > { %s1182_s7 = sshll.u32 %s284_s25, 7  ;;  %s2492_s27 = sand.u32 1, %s1829_s26  }
  0x6d   : > { %s286_s23 = scalar_lea.hbm %s2419_s0, %s1182_s7  ;;  %s2125_s29 = sshll.u32 %s2492_s27, 3 }
  0x6e   : > { %s275_s5 = scalar_lea.sflag [#allocation4], %s2003_s20  ;;  %s1626_s17 = scalar_lea.vmem %s289_s12, 512 }
  0x6f   : > { %p1627_p6 = scmp.ne.s32.totalorder %s289_s12, %s1626_s17  ;;  %p2493_p1 = pneg %p2007_p11 }
  0x70   : > { %s1868_s30 = smov [#allocation3]  }
  0x71   : > { %p1629_p3 = pnand %p1627_p6, %p2493_p1  ;;  %s1631_s8 = sshll.u32 %s1868_s30, 4  ;;  %s1632_s8 = int_to_ptr.vmem [resolvable:$false] %s1631_s8 }
  0x72   : > { %s1633_s15 = scalar_lea.vmem %s1632_s8, 1024  ;;  %p1634_p5 = scmp.lt.s32.totalorder %s289_s12, %s1632_s8 }
  0x73   : > { %p1630_p4 = pneg %p1629_p3  ;;  %p1635_p10 = scmp.lt.s32.totalorder %s1633_s15, %s1626_s17 }
  0x75   : > { %p1636_p9 = por %p1635_p10, %p1634_p5 }
  0x77   : > { %p1637_p8 = pnand %p1636_p9, %p1630_p4 }
  0x79   : > { %1640 = shalt.err (!%p1637_p8)
}
  0x7a   : > { %1409 = dma.hbm_to_vmem [thread:$0]  (!%p2007_p11), %s286_s23, 512, %s289_s12, %s275_s5  }
  0x7b   : > { %s327_s1 = scalar_lea.hbm %s2421_s2, %s2020_s14  ;;  %s322_s3 = scalar_lea.vmem [#allocation8], %s2125_s29 }
  0x7c   : > { %s329_s6 = sshll.u32 %s322_s3, 4  ;;  %s366_s17 = scalar_lea.hbm %s2423_s4, %s2020_s14  ;;  %s330_s6 = int_to_ptr.vmem [resolvable:$true] %s329_s6 }
  0x7d   : > { %s1654_s7 = scalar_lea.vmem %s330_s6, 128  ;;  %s1869_s21 = smov [#allocation8]  }
  0x7e   : > { %p1655_p8 = scmp.ne.s32.totalorder %s330_s6, %s1654_s7  ;;  %s1659_s28 = sshll.u32 %s1869_s21, 4  ;;  %s1660_s28 = int_to_ptr.vmem [resolvable:$false] %s1659_s28 }
  0x7f   : > { %s1661_s5 = scalar_lea.vmem %s1660_s28, 256  ;;  %p1662_p11 = scmp.lt.s32.totalorder %s330_s6, %s1660_s28 }
  0x80   : > { %p1657_p6 = pnand %p1655_p8, %p2091_p2  ;;  %p1663_p3 = scmp.lt.s32.totalorder %s1661_s5, %s1654_s7 }
  0x82   : > { %p1658_p1 = pneg %p1657_p6  ;;  %p1664_p4 = por %p1663_p3, %p1662_p11 }
  0x84   : > { %p1665_p5 = pnand %p1664_p4, %p1658_p1 }
  0x86   : > { %1668 = shalt.err (!%p1665_p5)
}
  0x87   : > { %s2494_s12 = scalar_lea.sflag [#allocation7], %s2012_s22  ;;  %s361_s13 = scalar_lea.vmem [#allocation11], %s2125_s29 }
  0x88   : > { %1415 = dma.hbm_to_vmem [thread:$0]  (!%p2078_p7), %s327_s1, 128, %s330_s6, %s2494_s12  }
  0x89   : > { %s368_s23 = sshll.u32 %s361_s13, 4  ;;  %s2495_s8 = sld [smem:[#allocation42_spill]]  ;;  %s369_s23 = int_to_ptr.vmem [resolvable:$true] %s368_s23 }
  0x8a   : > { %s1682_s24 = scalar_lea.vmem %s369_s23, 128  ;;  %s1870_s3 = smov [#allocation11]  }
  0x8b   : > { %p1683_p10 = scmp.ne.s32.totalorder %s369_s23, %s1682_s24  ;;  %s1687_s25 = sshll.u32 %s1870_s3, 4  ;;  %s1688_s25 = int_to_ptr.vmem [resolvable:$false] %s1687_s25 }
  0x8c   : > { %s1689_s11 = scalar_lea.vmem %s1688_s25, 256  ;;  %p1690_p6 = scmp.lt.s32.totalorder %s369_s23, %s1688_s25 }
  0x8d   : > { %p1685_p9 = pnand %p1683_p10, %p2091_p2  ;;  %p1691_p1 = scmp.lt.s32.totalorder %s1689_s11, %s1682_s24 }
  0x8f   : > { %s405_s20 = scalar_lea.hbm %s2495_s8, %s2020_s14  ;;  %p1686_p8 = pneg %p1685_p9 }
  0x90   : > { %p1692_p11 = por %p1691_p1, %p1690_p6 }
  0x92   : > { %p1693_p3 = pnand %p1692_p11, %p1686_p8 }
  0x94   : > { %1696 = shalt.err (!%p1693_p3)
}
  0x95   : > { %s2497_s1 = scalar_lea.sflag [#allocation10], %s2012_s22  ;;  %s400_s21 = scalar_lea.vmem [#allocation14], %s2125_s29 }
  0x96   : > { %1421 = dma.hbm_to_vmem [thread:$0]  (!%p2078_p7), %s366_s17, 128, %s369_s23, %s2497_s1  }
  0x97   : > { %s407_s28 = sshll.u32 %s400_s21, 4  ;;  %s1871_s12 = smov [#allocation14]   ;;  %s408_s28 = int_to_ptr.vmem [resolvable:$true] %s407_s28 }
  0x98   : > { %s1710_s5 = scalar_lea.vmem %s408_s28, 128  ;;  %s1715_s13 = sshll.u32 %s1871_s12, 4  ;;  %s1716_s13 = int_to_ptr.vmem [resolvable:$false] %s1715_s13 }
  0x99   : > { %p1711_p4 = scmp.ne.s32.totalorder %s408_s28, %s1710_s5  ;;  %s1717_s27 = scalar_lea.vmem %s1716_s13, 256 }
  0x9a   : > { %p1718_p9 = scmp.lt.s32.totalorder %s408_s28, %s1716_s13  ;;  %p1719_p8 = scmp.lt.s32.totalorder %s1717_s27, %s1710_s5 }
  0x9b   : > { %p1713_p5 = pnand %p1711_p4, %p2091_p2 }
  0x9c   : > { %p1720_p6 = por %p1719_p8, %p1718_p9 }
  0x9d   : > { %p1714_p10 = pneg %p1713_p5 }
  0x9f   : > { %p1721_p1 = pnand %p1720_p6, %p1714_p10 }
  0xa1   : > { %1724 = shalt.err (!%p1721_p1)
}
  0xa2   : > { %1427 = dma.hbm_to_vmem [thread:$0]  (!%p2078_p7), %s405_s20, 128, %s408_s28, %s376_s18  }
  0xa3   : > { %416 = sbr.rel (%p2043_p0) target bundleno = 1061 (0x425), region = 48  ;;  %s2499_s23 = sld [smem:[#allocation24_spill]] (!%p2043_p0) }
  0xa4   : > { %s2500_s30 = sld [smem:[#allocation32_spill]] (!%p2043_p0) }
  0xa9   : > { %s418_s8 = sand.u32 1, %s2499_s23  }
  0xaa   : > { %s1200_s24 = sshll.u32 %s418_s8, 5  ;;  %s419_s3 = scalar_lea.sflag [#allocation4], %s418_s8 }
  0xab   : > { %s2179_s25 = scalar_lea.vmem [#allocation3], %s1200_s24  ;;  %p2501_p2 = scmp.ne.s32.totalorder %s2500_s30, 0 }
  0xad   : > { %1796 = dma.done.wait (%p2501_p2), %s419_s3, 512  }
  0xae   : > { %1798 = vsyncadd (%p2501_p2), %s419_s3, 4294966784  ;;  %s2502_s22 = sld [smem:[#allocation29_spill]]  ;;  %s1201_s14 = sshll.u32 %s418_s8, 9 }
  0xaf   : > { %s2186_s20 = scalar_lea.vmem [#allocation6], %s1201_s14 }
  0xb4   : > { %s427_s16 = sand.u32 1, %s2502_s22  }
  0xb5   : > { %s428_s18 = scalar_lea.sflag [#allocation7], %s427_s16 }
  0xb6   : > { %1800 = dma.done.wait (%p2501_p2), %s428_s18, 8192  }
  0xb7   : > { %1802 = vsyncadd (%p2501_p2), %s428_s18, 4294959104  ;;  %s2503_s11 = sld [smem:[#allocation23_spill]] }
  0xbd   : > { %s2193_s6 = sand.u32 1, %s2503_s11  }
  0xbe   : > { %s2196_s7 = sshll.u32 %s2193_s6, 3 }
  0xbf   : > { %s440_s21 = scalar_lea.vmem [#allocation8], %s2196_s7 }
  0xc0   : > { %1804 = dma.done.wait (%p2063_p13), %s428_s18, 128  }
  0xc1   : > { %1806 = vsyncadd (%p2063_p13), %s428_s18, 4294967168  ;;  %s1203_s28 = sshll.u32 %s2193_s6, 7  ;;  %s446_s5 = scalar_lea.sflag [#allocation10], %s427_s16 }
  0xc2   : > { %s2204_s12 = scalar_lea.vmem [#allocation9], %s1203_s28 }
  0xc3   : > { %1808 = dma.done.wait (%p2063_p13), %s446_s5, 2176  }
  0xc4   : > { %1810 = vsyncadd (%p2063_p13), %s446_s5, 4294965120  ;;  %s458_s13 = scalar_lea.vmem [#allocation11], %s2196_s7  ;;  %s464_s27 = scalar_lea.sflag [#allocation13], %s427_s16 }
  0xc5   : > { %s2211_s29 = scalar_lea.vmem [#allocation12], %s1203_s28 }
  0xc6   : > { %1812 = dma.done.wait (%p2063_p13), %s464_s27, 2176  }
  0xc7   : > { %1814 = vsyncadd (%p2063_p13), %s464_s27, 4294965120  ;;  %s476_s17 = scalar_lea.vmem [#allocation14], %s2196_s7  ;;  %s536_s19 = scalar_lea.vmem [#allocation15], %s2196_s7 }
  0xc8   : > { %s2505_s23 = sld [smem:[#allocation26_spill]] }
  0xce   : > { %p1208_p7 = scmp.ne.s32.totalorder %s2505_s23, 0 }
  0xd0   : > { %542 = sbr.rel (%p1208_p7) target bundleno = 215 (0xd7), region = 80 }
  0xd5   : > { %v1872_v0 = vmov 0.0  }
  0xd6   : > { %543 = vst [vmem:[#allocation2] sm:$0xff] %v1872_v0 }
  0xd7 PF: > { %v580_v1 = vld [vmem:[%s2186_s20 + $0xf8] sm:$0xff]  ;;  %v579_v5 = vld [vmem:[%s2186_s20 + $0xf0] sm:$0xff]  ;;  %v578_v9 = vld [vmem:[%s2186_s20 + $0xe8] sm:$0xff]  ;;  %s2506_s30 = sld [smem:[#allocation26_spill]] }
  0xd8   : > { %v612_v2 = vld [vmem:[%s2186_s20 + $0x1f8] sm:$0xff]  ;;  %1216 = vmatprep.subr.mxu0 %v580_v1  ;;  %v611_v6 = vld [vmem:[%s2186_s20 + $0x1f0] sm:$0xff]  ;;  %v610_v10 = vld [vmem:[%s2186_s20 + $0x1e8] sm:$0xff] }
  0xd9   : > { %v564_v3 = vld [vmem:[%s2186_s20 + $0x78] sm:$0xff]  ;;  %1251 = vmatprep.subr.mxu1 %v612_v2  ;;  %v563_v7 = vld [vmem:[%s2186_s20 + $0x70] sm:$0xff]  ;;  %v562_v11 = vld [vmem:[%s2186_s20 + $0x68] sm:$0xff] }
  0xda   : > { %v596_v4 = vld [vmem:[%s2186_s20 + $0x178] sm:$0xff]  ;;  %1217 = vmatpush3.msra.mxu0 %v564_v3  ;;  %v595_v8 = vld [vmem:[%s2186_s20 + $0x170] sm:$0xff]  ;;  %v594_v12 = vld [vmem:[%s2186_s20 + $0x168] sm:$0xff] }
  0xdb   : > { %1252 = vmatpush3.msra.mxu1 %v596_v4  ;;  %1218 = vmatprep.subr.mxu0 %v579_v5  ;;  %v577_v13 = vld [vmem:[%s2186_s20 + $0xe0] sm:$0xff]  ;;  %v576_v17 = vld [vmem:[%s2186_s20 + $0xd8] sm:$0xff]  ;;  %v575_v21 = vld [vmem:[%s2186_s20 + $0xd0] sm:$0xff] }
  0xdc   : > { %1253 = vmatprep.subr.mxu1 %v611_v6  ;;  %1219 = vmatpush3.msra.mxu0 %v563_v7  ;;  %v609_v14 = vld [vmem:[%s2186_s20 + $0x1e0] sm:$0xff]  ;;  %v608_v18 = vld [vmem:[%s2186_s20 + $0x1d8] sm:$0xff]  ;;  %v607_v22 = vld [vmem:[%s2186_s20 + $0x1d0] sm:$0xff] }
  0xdd   : > { %1254 = vmatpush3.msra.mxu1 %v595_v8  ;;  %1220 = vmatprep.subr.mxu0 %v578_v9  ;;  %v561_v15 = vld [vmem:[%s2186_s20 + $0x60] sm:$0xff]  ;;  %v560_v19 = vld [vmem:[%s2186_s20 + $0x58] sm:$0xff]  ;;  %v559_v23 = vld [vmem:[%s2186_s20 + $0x50] sm:$0xff]  ;;  %p1209_p13 = scmp.ne.s32.totalorder %s2506_s30, 1 }
  0xde   : > { %1255 = vmatprep.subr.mxu1 %v610_v10  ;;  %v593_v16 = vld [vmem:[%s2186_s20 + $0x160] sm:$0xff]  ;;  %1221 = vmatpush3.msra.mxu0 %v562_v11  ;;  %v592_v20 = vld [vmem:[%s2186_s20 + $0x158] sm:$0xff]  ;;  %v591_v24 = vld [vmem:[%s2186_s20 + $0x150] sm:$0xff] }
  0xdf   : > { %1256 = vmatpush3.msra.mxu1 %v594_v12  ;;  %1222 = vmatprep.subr.mxu0 %v577_v13  ;;  %v574_v25 = vld [vmem:[%s2186_s20 + $0xc8] sm:$0xff]  ;;  %v573_v29 = vld [vmem:[%s2186_s20 + $0xc0] sm:$0xff]  ;;  %v572_v33 = vld [vmem:[%s2186_s20 + $0xb8] sm:$0xff] }
  0xe0   : > { %1257 = vmatprep.subr.mxu1 %v609_v14  ;;  %1223 = vmatpush3.msra.mxu0 %v561_v15  ;;  %v606_v26 = vld [vmem:[%s2186_s20 + $0x1c8] sm:$0xff]  ;;  %v605_v30 = vld [vmem:[%s2186_s20 + $0x1c0] sm:$0xff]  ;;  %v604_v34 = vld [vmem:[%s2186_s20 + $0x1b8] sm:$0xff] }
  0xe1   : > { %1258 = vmatpush3.msra.mxu1 %v593_v16  ;;  %1224 = vmatprep.subr.mxu0 %v576_v17  ;;  %v558_v27 = vld [vmem:[%s2186_s20 + $0x48] sm:$0xff]  ;;  %v557_v31 = vld [vmem:[%s2186_s20 + $0x40] sm:$0xff]  ;;  %v556_v35 = vld [vmem:[%s2186_s20 + $0x38] sm:$0xff] }
  0xe2   : > { %1259 = vmatprep.subr.mxu1 %v608_v18  ;;  %1225 = vmatpush3.msra.mxu0 %v560_v19  ;;  %v590_v28 = vld [vmem:[%s2186_s20 + $0x148] sm:$0xff]  ;;  %v589_v32 = vld [vmem:[%s2186_s20 + $0x140] sm:$0xff]  ;;  %v588_v36 = vld [vmem:[%s2186_s20 + $0x138] sm:$0xff] }
  0xe3   : > { %1260 = vmatpush3.msra.mxu1 %v592_v20  ;;  %1226 = vmatprep.subr.mxu0 %v575_v21  ;;  %v571_v37 = vld [vmem:[%s2186_s20 + $0xb0] sm:$0xff]  ;;  %v570_v41 = vld [vmem:[%s2186_s20 + $0xa8] sm:$0xff]  ;;  %v569_v45 = vld [vmem:[%s2186_s20 + $0xa0] sm:$0xff] }
  0xe4   : > { %1261 = vmatprep.subr.mxu1 %v607_v22  ;;  %1227 = vmatpush3.msra.mxu0 %v559_v23  ;;  %v603_v38 = vld [vmem:[%s2186_s20 + $0x1b0] sm:$0xff]  ;;  %v602_v42 = vld [vmem:[%s2186_s20 + $0x1a8] sm:$0xff]  ;;  %v601_v46 = vld [vmem:[%s2186_s20 + $0x1a0] sm:$0xff] }
  0xe5   : > { %1262 = vmatpush3.msra.mxu1 %v591_v24  ;;  %1228 = vmatprep.subr.mxu0 %v574_v25  ;;  %v555_v39 = vld [vmem:[%s2186_s20 + $0x30] sm:$0xff]  ;;  %v554_v43 = vld [vmem:[%s2186_s20 + $0x28] sm:$0xff]  ;;  %v553_v47 = vld [vmem:[%s2186_s20 + $0x20] sm:$0xff] }
  0xe6   : > { %1263 = vmatprep.subr.mxu1 %v606_v26  ;;  %1229 = vmatpush3.msra.mxu0 %v558_v27  ;;  %v587_v40 = vld [vmem:[%s2186_s20 + $0x130] sm:$0xff]  ;;  %v586_v44 = vld [vmem:[%s2186_s20 + $0x128] sm:$0xff]  ;;  %v585_v48 = vld [vmem:[%s2186_s20 + $0x120] sm:$0xff] }
  0xe7   : > { %1264 = vmatpush3.msra.mxu1 %v590_v28  ;;  %1230 = vmatprep.subr.mxu0 %v573_v29  ;;  %v568_v49 = vld [vmem:[%s2186_s20 + $0x98] sm:$0xff]  ;;  %v567_v53 = vld [vmem:[%s2186_s20 + $0x90] sm:$0xff]  ;;  %v566_v57 = vld [vmem:[%s2186_s20 + $0x88] sm:$0xff] }
  0xe8   : > { %1265 = vmatprep.subr.mxu1 %v605_v30  ;;  %1231 = vmatpush3.msra.mxu0 %v557_v31  ;;  %v600_v50 = vld [vmem:[%s2186_s20 + $0x198] sm:$0xff]  ;;  %v599_v54 = vld [vmem:[%s2186_s20 + $0x190] sm:$0xff]  ;;  %v598_v58 = vld [vmem:[%s2186_s20 + $0x188] sm:$0xff] }
  0xe9   : > { %1266 = vmatpush3.msra.mxu1 %v589_v32  ;;  %1232 = vmatprep.subr.mxu0 %v572_v33  ;;  %v552_v51 = vld [vmem:[%s2186_s20 + $0x18] sm:$0xff]  ;;  %v551_v55 = vld [vmem:[%s2186_s20 + $0x10] sm:$0xff]  ;;  %v550_v59 = vld [vmem:[%s2186_s20 + $0x8] sm:$0xff] }
  0xea   : > { %1267 = vmatprep.subr.mxu1 %v604_v34  ;;  %1233 = vmatpush3.msra.mxu0 %v556_v35  ;;  %v584_v52 = vld [vmem:[%s2186_s20 + $0x118] sm:$0xff]  ;;  %v583_v56 = vld [vmem:[%s2186_s20 + $0x110] sm:$0xff]  ;;  %v582_v60 = vld [vmem:[%s2186_s20 + $0x108] sm:$0xff] }
  0xeb   : > { %1268 = vmatpush3.msra.mxu1 %v588_v36  ;;  %1234 = vmatprep.subr.mxu0 %v571_v37  ;;  %v565_v61 = vld [vmem:[%s2186_s20 + $0x80] sm:$0xff]  ;;  %v546_v0 = vld [vmem:[%s2179_s25 + $0x8] sm:$0xff]  ;;  %v548_v2 = vld [vmem:[%s2179_s25 + $0x18] sm:$0xff] }
  0xec   : > { %1269 = vmatprep.subr.mxu1 %v603_v38  ;;  %1235 = vmatpush3.msra.mxu0 %v555_v39  ;;  %v597_v62 = vld [vmem:[%s2186_s20 + $0x180] sm:$0xff]  ;;  %v547_v4 = vld [vmem:[%s2179_s25 + $0x10] sm:$0xff]  ;;  %v544_v11 = vld [vmem:[#allocation2] sm:$0xff] }
  0xed   : > { %1270 = vmatpush3.msra.mxu1 %v587_v40  ;;  %1236 = vmatprep.subr.mxu0 %v570_v41  ;;  %v549_v63 = vld [vmem:[%s2186_s20] sm:$0xff] }
  0xee   : > { %1271 = vmatprep.subr.mxu1 %v602_v42  ;;  %1237 = vmatpush3.msra.mxu0 %v554_v43  ;;  %v581_v1 = vld [vmem:[%s2186_s20 + $0x100] sm:$0xff] }
  0xef   : > { %1272 = vmatpush3.msra.mxu1 %v586_v44  ;;  %1238 = vmatprep.subr.mxu0 %v569_v45  ;;  %v545_v3 = vld [vmem:[%s2179_s25] sm:$0xff] }
  0xf0   : > { %1273 = vmatprep.subr.mxu1 %v601_v46  ;;  %1239 = vmatpush3.msra.mxu0 %v553_v47 }
  0xf1   : > { %1274 = vmatpush3.msra.mxu1 %v585_v48  ;;  %1240 = vmatprep.subr.mxu0 %v568_v49 }
  0xf2   : > { %1275 = vmatprep.subr.mxu1 %v600_v50  ;;  %1241 = vmatpush3.msra.mxu0 %v552_v51 }
  0xf3   : > { %1276 = vmatpush3.msra.mxu1 %v584_v52  ;;  %1242 = vmatprep.subr.mxu0 %v567_v53 }
  0xf4   : > { %1277 = vmatprep.subr.mxu1 %v599_v54  ;;  %1243 = vmatpush3.msra.mxu0 %v551_v55 }
  0xf5   : > { %1278 = vmatpush3.msra.mxu1 %v583_v56  ;;  %1244 = vmatprep.subr.mxu0 %v566_v57 }
  0xf6   : > { %1279 = vmatprep.subr.mxu1 %v598_v58  ;;  %1245 = vmatpush3.msra.mxu0 %v550_v59 }
  0xf7   : > { %1280 = vmatpush3.msra.mxu1 %v582_v60  ;;  %1246 = vmatprep.subr.mxu0 %v565_v61 }
  0xf8   : > { %1281 = vmatprep.subr.mxu1 %v597_v62  ;;  %1247 = vmatpush3.msra.mxu0 %v549_v63 }
  0xf9   : > { %677 = vmatprep.mubr.f32.mxu0 %v546_v0  ;;  %1282 = vmatpush3.msra.mxu1 %v581_v1 }
  0xfa   : > { %747 = vmatprep.mubr.f32.mxu1 %v548_v2  ;;  %678 = vmatmul.mubr.f32.vlgmr.msra.gmra.mxu0 %v545_v3 }
  0xfb   : > { %748 = vmatmul.mubr.f32.vlgmr.msra.gmra.mxu1 %v547_v4 }
 0x1ba   : > { %v1248_v5 = vpop.f32.mrf.mxu0 }
 0x1bb   : > { %v1283_v6 = vpop.f32.mrf.mxu1 }
 0x1bc   : > { %v1249_v7 = vpop.f32.mrf.mxu0 }
 0x1bd   : > { %v1284_v8 = vpop.f32.mrf.mxu1  ;;  %v1250_v9 = vadd.f32 %v1249_v7, %v1248_v5 }
 0x1be   : > { %v1285_v10 = vadd.f32 %v1284_v8, %v1283_v6 }
 0x1c0   : > { %v750_v12 = vadd.f32 %v1285_v10, %v1250_v9  ;;  %758 = sbr.rel (%p1209_p13) target bundleno = 1037 (0x40d), region = 84 }
 0x1c2   : > { %v753_v13 = vadd.f32 %v750_v12, %v544_v11 }
 0x1c4   : > { %754 = vst [vmem:[#allocation2] sm:$0xff] %v753_v13 }
 0x1c5   : > { %v778_v14 = vld [vmem:[%s2204_s12 + $0x78] sm:$0xff]  ;;  %v1873_v15 = vmov 0.0   ;;  %v777_v16 = vld [vmem:[%s2204_s12 + $0x70] sm:$0xff]  ;;  %vm1874_vm0 = vmmov 0   ;;  %v776_v17 = vld [vmem:[%s2204_s12 + $0x68] sm:$0xff] }
 0x1c6   : > { %1320 = vmatprep.subr.mxu0 %v1873_v15  ;;  %1352 = vmatprep.mubr.msk.f32.mxu0 %vm1874_vm0, %v1873_v15  ;;  %v775_v18 = vld [vmem:[%s2204_s12 + $0x60] sm:$0xff]  ;;  %v866_v19 = vld [vmem:[%s2211_s29 + $0x78] sm:$0xff]  ;;  %v774_v21 = vld [vmem:[%s2204_s12 + $0x58] sm:$0xff] }
 0x1c7   : > { %1321 = vmatpush3.msra.mxu0 %v778_v14  ;;  %1355 = vmatprep.subr.mxu1 %v1873_v15  ;;  %v865_v20 = vld [vmem:[%s2211_s29 + $0x70] sm:$0xff]  ;;  %v864_v22 = vld [vmem:[%s2211_s29 + $0x68] sm:$0xff]  ;;  %v773_v23 = vld [vmem:[%s2204_s12 + $0x50] sm:$0xff] }
 0x1c8   : > { %1322 = vmatprep.subr.mxu0 %v1873_v15  ;;  %1387 = vmatprep.mubr.msk.f32.mxu1 %vm1874_vm0, %v1873_v15  ;;  %v863_v24 = vld [vmem:[%s2211_s29 + $0x60] sm:$0xff]  ;;  %v772_v25 = vld [vmem:[%s2204_s12 + $0x48] sm:$0xff]  ;;  %v771_v27 = vld [vmem:[%s2204_s12 + $0x40] sm:$0xff] }
 0x1c9   : > { %1323 = vmatpush3.msra.mxu0 %v777_v16  ;;  %1356 = vmatpush3.msra.mxu1 %v866_v19  ;;  %v862_v26 = vld [vmem:[%s2211_s29 + $0x58] sm:$0xff]  ;;  %v861_v28 = vld [vmem:[%s2211_s29 + $0x50] sm:$0xff]  ;;  %v770_v29 = vld [vmem:[%s2204_s12 + $0x38] sm:$0xff] }
 0x1ca   : > { %1324 = vmatprep.subr.mxu0 %v1873_v15  ;;  %1357 = vmatprep.subr.mxu1 %v1873_v15  ;;  %v860_v30 = vld [vmem:[%s2211_s29 + $0x48] sm:$0xff]  ;;  %v769_v31 = vld [vmem:[%s2204_s12 + $0x30] sm:$0xff]  ;;  %v768_v33 = vld [vmem:[%s2204_s12 + $0x28] sm:$0xff] }
 0x1cb   : > { %1325 = vmatpush3.msra.mxu0 %v776_v17  ;;  %1358 = vmatpush3.msra.mxu1 %v865_v20  ;;  %v859_v32 = vld [vmem:[%s2211_s29 + $0x40] sm:$0xff]  ;;  %v858_v34 = vld [vmem:[%s2211_s29 + $0x38] sm:$0xff]  ;;  %v767_v35 = vld [vmem:[%s2204_s12 + $0x20] sm:$0xff] }
 0x1cc   : > { %1326 = vmatprep.subr.mxu0 %v1873_v15  ;;  %1359 = vmatprep.subr.mxu1 %v1873_v15  ;;  %v759_v36 = vld [vmem:[#allocation2] sm:$0xff]  ;;  %v760_v37 = vld [vmem:[%s440_s21] sm:$0xff]  ;;  %v857_v38 = vld [vmem:[%s2211_s29 + $0x30] sm:$0xff] }
 0x1cd   : > { %1327 = vmatpush3.msra.mxu0 %v775_v18  ;;  %1360 = vmatpush3.msra.mxu1 %v864_v22  ;;  %v766_v39 = vld [vmem:[%s2204_s12 + $0x18] sm:$0xff]  ;;  %v765_v41 = vld [vmem:[%s2204_s12 + $0x10] sm:$0xff]  ;;  %v761_v42 = vadd.f32 %v760_v37, %v759_v36  ;;  %v764_v44 = vld [vmem:[%s2204_s12 + $0x8] sm:$0xff] }
 0x1ce   : > { %1328 = vmatprep.subr.mxu0 %v1873_v15  ;;  %1361 = vmatprep.subr.mxu1 %v1873_v15  ;;  %v856_v40 = vld [vmem:[%s2211_s29 + $0x28] sm:$0xff]  ;;  %v855_v43 = vld [vmem:[%s2211_s29 + $0x20] sm:$0xff]  ;;  %v854_v45 = vld [vmem:[%s2211_s29 + $0x18] sm:$0xff] }
 0x1cf   : > { %1329 = vmatpush3.msra.mxu0 %v774_v21  ;;  %1362 = vmatpush3.msra.mxu1 %v863_v24  ;;  %v763_v46 = vld [vmem:[%s2204_s12] sm:$0xff]  ;;  %v762_v47 = vmax.f32 %v761_v42, 0.0  ;;  %v852_v49 = vld [vmem:[%s2211_s29 + $0x8] sm:$0xff]  ;;  %v851_v50 = vld [vmem:[%s2211_s29] sm:$0xff] }
 0x1d0   : > { %1330 = vmatprep.subr.mxu0 %v1873_v15  ;;  %1363 = vmatprep.subr.mxu1 %v1873_v15  ;;  %v853_v48 = vld [vmem:[%s2211_s29 + $0x10] sm:$0xff]  ;;  %v867_v56 = vld [vmem:[%s476_s17] sm:$0xff] }
 0x1d1   : > { %1331 = vmatpush3.msra.mxu0 %v773_v23  ;;  %1364 = vmatpush3.msra.mxu1 %v862_v26  ;;  %v779_v51 = vld [vmem:[%s458_s13] sm:$0xff] }
 0x1d2   : > { %1332 = vmatprep.subr.mxu0 %v1873_v15  ;;  %1365 = vmatprep.subr.mxu1 %v1873_v15 }
 0x1d3   : > { %1333 = vmatpush3.msra.mxu0 %v772_v25  ;;  %1366 = vmatpush3.msra.mxu1 %v861_v28 }
 0x1d4   : > { %1334 = vmatprep.subr.mxu0 %v1873_v15  ;;  %1367 = vmatprep.subr.mxu1 %v1873_v15 }
 0x1d5   : > { %1335 = vmatpush3.msra.mxu0 %v771_v27  ;;  %1368 = vmatpush3.msra.mxu1 %v860_v30 }
 0x1d6   : > { %1336 = vmatprep.subr.mxu0 %v1873_v15  ;;  %1369 = vmatprep.subr.mxu1 %v1873_v15 }
 0x1d7   : > { %1337 = vmatpush3.msra.mxu0 %v770_v29  ;;  %1370 = vmatpush3.msra.mxu1 %v859_v32 }
 0x1d8   : > { %1338 = vmatprep.subr.mxu0 %v1873_v15  ;;  %1371 = vmatprep.subr.mxu1 %v1873_v15 }
 0x1d9   : > { %1339 = vmatpush3.msra.mxu0 %v769_v31  ;;  %1372 = vmatpush3.msra.mxu1 %v858_v34 }
 0x1da   : > { %1340 = vmatprep.subr.mxu0 %v1873_v15  ;;  %1373 = vmatprep.subr.mxu1 %v1873_v15 }
 0x1db   : > { %1341 = vmatpush3.msra.mxu0 %v768_v33  ;;  %1374 = vmatpush3.msra.mxu1 %v857_v38 }
 0x1dc   : > { %1342 = vmatprep.subr.mxu0 %v1873_v15  ;;  %1375 = vmatprep.subr.mxu1 %v1873_v15 }
 0x1dd   : > { %1343 = vmatpush3.msra.mxu0 %v767_v35  ;;  %1376 = vmatpush3.msra.mxu1 %v856_v40 }
 0x1de   : > { %1344 = vmatprep.subr.mxu0 %v1873_v15  ;;  %1377 = vmatprep.subr.mxu1 %v1873_v15 }
 0x1df   : > { %1345 = vmatpush3.msra.mxu0 %v766_v39  ;;  %1378 = vmatpush3.msra.mxu1 %v855_v43 }
 0x1e0   : > { %1346 = vmatprep.subr.mxu0 %v1873_v15  ;;  %1379 = vmatprep.subr.mxu1 %v1873_v15 }
 0x1e1   : > { %1347 = vmatpush3.msra.mxu0 %v765_v41  ;;  %1380 = vmatpush3.msra.mxu1 %v854_v45 }
 0x1e2   : > { %1348 = vmatprep.subr.mxu0 %v1873_v15  ;;  %1381 = vmatprep.subr.mxu1 %v1873_v15 }
 0x1e3   : > { %1349 = vmatpush3.msra.mxu0 %v764_v44  ;;  %1382 = vmatpush3.msra.mxu1 %v853_v48 }
 0x1e4   : > { %1350 = vmatprep.subr.mxu0 %v1873_v15  ;;  %1383 = vmatprep.subr.mxu1 %v1873_v15 }
 0x1e5   : > { %1351 = vmatpush3.msra.mxu0 %v763_v46  ;;  %1384 = vmatpush3.msra.mxu1 %v852_v49 }
 0x1e6   : > { %1353 = vmatmul.mubr.f32.vlgmr.msra.gmra.mxu0 %v762_v47  ;;  %1385 = vmatprep.subr.mxu1 %v1873_v15 }
 0x1e7   : > { %1386 = vmatpush3.msra.mxu1 %v851_v50 }
 0x2a6   : > { %v846_v52 = vpop.f32.mrf.mxu0 }
 0x2a7   : > { %v847_v53 = vadd.f32 %v846_v52, %v779_v51 }
 0x2a8   : > { %v1354_v54 = vpop.f32.mrf.mxu0 }
 0x2a9   : > { %v850_v55 = vmax.f32 %v847_v53, 0.0 }
 0x2ab   : > { %1388 = vmatmul.mubr.f32.vlgmr.msra.gmra.mxu1 %v850_v55 }
 0x36b   : > { %v934_v57 = vpop.f32.mrf.mxu1 }
 0x36c   : > { %v935_v58 = vadd.f32 %v934_v57, %v867_v56 }
 0x36d   : > { %v1389_v59 = vpop.f32.mrf.mxu1 }
 0x36e   : > { %v938_v60 = vmul.f32 %v935_v58, %v935_v58 }
 0x370   : > { %939 = vadd.xlane.f32.xlu0 %v938_v60 }
 0x3f9   : > { %v940_v61 = vpop.xlane.xlu0 %939 }
 0x3fa   : > { %v941_v62 = vmax.f32 %v940_v61, 1e-24 }
 0x3fc   : > { %1527 = vrsqrt.f32 %v941_v62 }
 0x409   : > { %v1528_v63 = vpop.eup %1527 }
 0x40a   : > { %v943_v0 = vmul.f32 %v1528_v63, %v935_v58 }
 0x40c   : > { %944 = vst [vmem:[%s536_s19] sm:$0xff] %v943_v0 }
 0x40d PF: > { %s2507_s8 = sld [smem:[#allocation27_spill]]  ;;  %s959_s18 = sshll.u32 %s536_s19, 4  ;;  %s960_s18 = int_to_ptr.vmem [resolvable:$true] %s959_s18 }
 0x40e   : > { %s2509_s16 = sld [smem:[#allocation43_spill]]  ;;  %s946_s20 = scalar_lea.sflag [#allocation5], %s2193_s6 }
 0x40f   : > { %s1725_s11 = scalar_lea.vmem %s960_s18, 128  ;;  %s1875_s1 = smov [#allocation15]  }
 0x410   : > { %p1726_p0 = scmp.ne.s32.totalorder %s960_s18, %s1725_s11  ;;  %s1729_s21 = sshll.u32 %s1875_s1, 4  ;;  %s1730_s21 = int_to_ptr.vmem [resolvable:$false] %s1729_s21 }
 0x411   : > { %s1731_s28 = scalar_lea.vmem %s1730_s21, 256  ;;  %p1732_p4 = scmp.lt.s32.totalorder %s960_s18, %s1730_s21 }
 0x412   : > { %p1727_p11 = pnand %p1726_p0, %p2067_p12  ;;  %p1733_p5 = scmp.lt.s32.totalorder %s1731_s28, %s1725_s11 }
 0x413   : > { %s1211_s3 = sshll.u32 %s2507_s8, 7 }
 0x414   : > { %s957_s14 = scalar_lea.hbm %s2509_s16, %s1211_s3  ;;  %p1728_p3 = pneg %p1727_p11 }
 0x415   : > { %p1734_p10 = por %p1733_p5, %p1732_p4 }
 0x417   : > { %p1735_p9 = pnand %p1734_p10, %p1728_p3 }
 0x419   : > { %1738 = shalt.err (!%p1735_p9)
}
 0x41a   : > { %s1739_s5 = scalar_lea.hbm %s957_s14, 128  ;;  %s1743_s12 = scalar_lea.hbm %s2509_s16, 256 }
 0x41b   : > { %p1740_p8 = scmp.ne.s32.totalorder %s957_s14, %s1739_s5  ;;  %p1744_p2 = scmp.lt.s32.totalorder %s957_s14, %s2509_s16 }
 0x41c   : > { %p1745_p7 = scmp.lt.s32.totalorder %s1743_s12, %s1739_s5 }
 0x41d   : > { %p1741_p6 = pnand %p1740_p8, %p2067_p12 }
 0x41e   : > { %p1746_p13 = por %p1745_p7, %p1744_p2 }
 0x41f   : > { %p1742_p1 = pneg %p1741_p6 }
 0x421   : > { %p1747_p0 = pnand %p1746_p13, %p1742_p1 }
 0x423   : > { %1750 = shalt.err (!%p1747_p0)
}
 0x424   : > { %1404 = dma.vmem_to_hbm [thread:$0]  (%p2067_p12), %s960_s18, 128, %s957_s14, %s946_s20  }
 0x425 PF: > { %s2510_s29 = sld [smem:[#allocation28_spill]] }
 0x426   : > { %s2511_s17 = sld [smem:[#allocation22_spill]] }
 0x427   : > { %s2512_s19 = sld [smem:[#allocation38_spill]] }
 0x42b   : > { %p1433_p11 = scmp.ge.s32.totalorder %s2510_s29, 2 }
 0x42c   : > { %s971_s23 = sand.u32 1, %s2511_s17  }
 0x42d   : > { %p2513_p3 = scmp.ne.s32.totalorder %s2512_s19, 0  ;;  %s972_s30 = scalar_lea.sflag [#allocation5], %s971_s23 }
 0x42f   : > { %p1429_p4 = pnand %p1433_p11, %p2513_p3 }
 0x431   : > { %p1430_p5 = pneg %p1429_p4 }
 0x433   : > { %1816 = dma.done.wait (%p1430_p5), %s972_s30, 128  }
 0x434   : > { %1818 = vsyncadd (%p1430_p5), %s972_s30, 4294967168  ;;  %s32_s11 = sadd.s32 1, %s2510_s29   ;;  %s2514_s24 = sld [smem:[#allocation23_spill]] }
 0x435   : > { %p29_p10 = scmp.ge.s32.totalorder %s32_s11, 6   ;;  %s2515_s8 = sld [smem:[#allocation35_spill]] }
 0x436   : > { %s2516_s27 = sld [smem:[#allocation24_spill]]  ;;  %s2521_s25 = smov %s1829_s26 }
 0x437   : > { %s2517_s28 = sld [smem:[#allocation25_spill]]  ;;  %s2523_s30 = smov %s1853_s9 }
 0x438   : > { %s2518_s29 = sld [smem:[#allocation33_spill]] }
 0x439   : > { %s2519_s3 = sld [smem:[#allocation30_spill]] }
 0x43a   : > { %s2520_s22 = sld [smem:[#allocation31_spill]] }
 0x43b   : > { %s2522_s26 = smov %s2515_s8  ;;  %s2524_s8 = smov %s1857_s10 }
 0x43c   :  { %31 = sbr.rel (!%p29_p10) target bundleno = 21 (0x15), region = 173 }
 0x43f   : > { %s2525_s9 = smov %s2519_s3 }
 0x440   : > { %s2526_s10 = smov %s2520_s22 }
 0x441   :  { %977 = vsyncpa [#allocation4], 1 }
 0x442   :  { %979 = vsyncpa [#allocation4 + $0x1], 1 }
 0x443   :  { %980 = vsyncpa [#allocation7], 1 }
 0x444   :  { %982 = vsyncpa [#allocation7 + $0x1], 1 }
 0x445   :  { %983 = vsyncpa [#allocation10], 1 }
 0x446   :  { %985 = vsyncpa [#allocation10 + $0x1], 1 }
 0x447   :  { %986 = vsyncpa [#allocation13], 1 }
 0x448   :  { %988 = vsyncpa [#allocation13 + $0x1], 1 }
 0x449   :  { %989 = vsyncpa [#allocation5], 1 }
 0x44a   :  { %991 = vsyncpa [#allocation5 + $0x1], 1 }

</bundles_post_ra>
